<compile_context>
chip_gen: v5e
topology: v5e:2x2
jax: 0.10.0
libtpu: 0.0.40
codegen_flags: <defaults>
</compile_context>

<pallas_src>
import functools

import jax
import jax.numpy as jnp
from jax.experimental import pallas as pl
from jax.experimental.pallas import tpu as pltpu


def _vmem_limit_bytes(default=48 * 1024 * 1024):
    """Derive a scoped-VMEM limit from the device, leaving headroom."""
    try:
        cap = int(pltpu.get_tpu_info().vmem_capacity_bytes)
    except Exception:
        return default
    return max(32 * 1024 * 1024, min(int(cap * 3 // 4), 100 * 1024 * 1024))


def _layer_norm(x, gamma, beta, eps=1e-5):
    mu = jnp.mean(x, axis=-1, keepdims=True)
    var = jnp.mean((x - mu) ** 2, axis=-1, keepdims=True)   # biased, like nn.LayerNorm
    return (x - mu) * jax.lax.rsqrt(var + eps) * gamma + beta


# -----------------------------------------------------------------------------
# Kernel 0: Q/K/V head projections as full-width (E, E) block-diagonal matmuls.
# (1/sqrt(E) softmax scale is pre-folded into Wq on the host.)
# -----------------------------------------------------------------------------
def qkv_projection_kernel(q_ref, k_ref, v_ref, wq_ref, wk_ref, wv_ref,
                          qo_ref, ko_ref, vo_ref):
    qo_ref[...] = jnp.dot(q_ref[...], wq_ref[...],
                          preferred_element_type=jnp.float32).astype(qo_ref.dtype)
    ko_ref[...] = jnp.dot(k_ref[...], wk_ref[...],
                          preferred_element_type=jnp.float32).astype(ko_ref.dtype)
    vo_ref[...] = jnp.dot(v_ref[...], wv_ref[...],
                          preferred_element_type=jnp.float32).astype(vo_ref.dtype)


# -----------------------------------------------------------------------------
# Kernel 1: flash attention over pre-projected heads + fused fc_out projection.
# grid = (batch, q_tiles, kv_tiles); online softmax with f32 VMEM accumulators.
# -----------------------------------------------------------------------------
def flash_attention_kernel(qh_ref, kh_ref, vh_ref, bias_ref, wo_ref, bo_ref,
                           out_ref, m_sc, l_sc, acc_sc,
                           *, compute_dtype, approx_recip):
    cdt = compute_dtype
    kv = pl.program_id(2)

    @pl.when(kv == 0)
    def _init():
        m_sc[...] = jnp.full_like(m_sc, -jnp.inf)
        l_sc[...] = jnp.zeros_like(l_sc)
        acc_sc[...] = jnp.zeros_like(acc_sc)

    qp = qh_ref[...]          # (H, TQ, D)  already projected & scaled, dtype=cdt
    kp = kh_ref[...]          # (H, TKV, D)
    vp = vh_ref[...]          # (H, TKV, D)

    # Scores for this kv tile, all heads batched; additive mask bias (0 / -1e20).
    s = jnp.einsum("hqd,hkd->hqk", qp, kp, preferred_element_type=jnp.float32)
    s = s + bias_ref[...][None, :, :]

    # Online softmax (f32 accumulators in VMEM scratch).
    m_prev = m_sc[...]
    m_new = jnp.maximum(m_prev, jnp.max(s, axis=-1, keepdims=True))
    alpha = jnp.exp(m_prev - m_new)
    p = jnp.exp(s - m_new)
    l_sc[...] = alpha * l_sc[...] + jnp.sum(p, axis=-1, keepdims=True)
    acc_sc[...] = alpha * acc_sc[...] + jnp.einsum(
        "hqk,hkd->hqd", p.astype(cdt), vp, preferred_element_type=jnp.float32)
    m_sc[...] = m_new

    @pl.when(kv == pl.num_programs(2) - 1)
    def _finalize():
        inv_l = pl.reciprocal(l_sc[...], approx=approx_recip)
        heads = (acc_sc[...] * inv_l).astype(cdt)           # (H, TQ, D)
        # fc_out ("concat heads" @ Wo^T + bo): head-batched matmul + reduce over
        # heads.  (Mosaic dot_general does not take two contracting dims, so the
        # single 'hqd,hde->qe' contraction is expressed this way.)
        proj = jnp.einsum("hqd,hde->hqe", heads, wo_ref[...],
                          preferred_element_type=jnp.float32)
        out_ref[...] = (jnp.sum(proj, axis=0) + bo_ref[...]).astype(out_ref.dtype)


# -----------------------------------------------------------------------------
# Kernel 2: epilogue — residual + LayerNorm1 + FFN (streamed over FE chunks) +
# residual + LayerNorm2.  grid = (batch, q_tiles, ff_chunks).
# -----------------------------------------------------------------------------
def epilogue_kernel(attn_ref, res_ref, g1_ref, be1_ref, w1_ref, b1_ref,
                    w2_ref, b2_ref, g2_ref, be2_ref, out_ref,
                    x_sc, ff_sc, *, compute_dtype):
    cdt = compute_dtype
    fe = pl.program_id(2)

    @pl.when(fe == 0)
    def _init():
        attn = attn_ref[...].astype(jnp.float32)
        res = res_ref[...].astype(jnp.float32)
        # TODO(synk): dropout omitted (eval-mode identity).
        x_sc[...] = _layer_norm(attn + res, g1_ref[...], be1_ref[...])
        ff_sc[...] = jnp.zeros_like(ff_sc)

    x = x_sc[...]
    h1 = jnp.dot(x.astype(cdt), w1_ref[...],
                 preferred_element_type=jnp.float32) + b1_ref[...]
    h1 = jnp.maximum(h1, 0.0)
    ff_sc[...] += jnp.dot(h1.astype(cdt), w2_ref[...],
                          preferred_element_type=jnp.float32)

    @pl.when(fe == pl.num_programs(2) - 1)
    def _finalize():
        out = _layer_norm(ff_sc[...] + b2_ref[...] + x_sc[...],
                          g2_ref[...], be2_ref[...])
        out_ref[...] = out.astype(out_ref.dtype)


# -----------------------------------------------------------------------------
# Wrapper
# -----------------------------------------------------------------------------
def transformer_block(q, k, v, mask, params, *, heads,
                      block_q=None, block_kv=None, block_ff=None,
                      compute_dtype=jnp.bfloat16):
    N, L, E = q.shape
    H = heads
    assert E % H == 0
    D = E // H
    FE = params["w1"].shape[0]

    if block_q is None:
        block_q = min(L, 128)
    if block_kv is None:
        block_kv = min(L, 256)        # fills the 256-wide MXU on v6e/v7x
    if block_ff is None:
        block_ff = min(FE, 512)
    assert L % block_q == 0 and L % block_kv == 0 and FE % block_ff == 0
    n_q, n_kv, n_ff = L // block_q, L // block_kv, FE // block_ff

    cdt = jnp.dtype(compute_dtype)
    f32 = jnp.float32
    scale = 1.0 / (E ** 0.5)
    vmem_limit = _vmem_limit_bytes()
    resident = pl.BlockSpec(memory_space=pltpu.MemorySpace.VMEM)

    # ----------------- host-side weight / layout preprocessing -----------------
    eye_h = jnp.eye(H, dtype=f32)

    def head_block_diag(w_t):   # per-head (D, D) weight -> block-diagonal (E, E)
        return jnp.einsum("hk,de->hdke", eye_h, w_t.astype(f32)).reshape(E, E)

    wq_bd = (head_block_diag(params["wq"].T) * scale).astype(cdt)   # scale folded in
    wk_bd = head_block_diag(params["wk"].T).astype(cdt)
    wv_bd = head_block_diag(params["wv"].T).astype(cdt)
    wo_heads = params["wo"].T.reshape(H, D, E).astype(cdt)
    w1_t = params["w1"].T.astype(cdt)        # (E, FE)
    w2_t = params["w2"].T.astype(cdt)        # (FE, E)
    bo = params["bo"].astype(f32)
    b1 = params["b1"].astype(f32)
    b2 = params["b2"].astype(f32)
    g1, be1 = params["g1"].astype(f32), params["be1"].astype(f32)
    g2, be2 = params["g2"].astype(f32), params["be2"].astype(f32)

    # Additive mask bias (one VPU add in the kernel), re-laid out so both sequence
    # dims tile cleanly: (N, Lq, Lk) -> (N, n_kv, Lq, block_kv).
    bias = jnp.where(mask == 0, jnp.float32(-1e20), jnp.float32(0.0))
    bias = bias.reshape(N, L, n_kv, block_kv).transpose(0, 2, 1, 3)

    # ------------- kernel 0: Q/K/V projections (hoisted out of attention) -------
    block_l = min(L, 256)
    while L % block_l:
        block_l //= 2
    n_l = L // block_l
    row_spec = pl.BlockSpec((None, block_l, E), lambda n, l: (n, l, 0))

    qp, kp, vp = pl.pallas_call(
        qkv_projection_kernel,
        out_shape=(jax.ShapeDtypeStruct((N, L, E), cdt),
                   jax.ShapeDtypeStruct((N, L, E), cdt),
                   jax.ShapeDtypeStruct((N, L, E), cdt)),
        grid_spec=pltpu.PrefetchScalarGridSpec(
            num_scalar_prefetch=0,
            grid=(N, n_l),
            in_specs=[row_spec, row_spec, row_spec, resident, resident, resident],
            out_specs=[row_spec, row_spec, row_spec]),
        compiler_params=pltpu.CompilerParams(
            dimension_semantics=("parallel", "parallel"),
            vmem_limit_bytes=vmem_limit),
        cost_estimate=pl.CostEstimate(
            flops=int(6 * N * L * E * E), transcendentals=0,
            bytes_accessed=int((6 * N * L * E + 3 * E * E) * cdt.itemsize)),
    )(q.astype(cdt), k.astype(cdt), v.astype(cdt), wq_bd, wk_bd, wv_bd)

    # Head-split layout plumbing (pure XLA transpose, no compute).
    def to_heads(x):
        return x.reshape(N, L, H, D).transpose(0, 2, 1, 3)   # (N, H, L, D)

    qh, kh, vh = to_heads(qp), to_heads(kp), to_heads(vp)

    # ----------------------- kernel 1: flash attention --------------------------
    attn = pl.pallas_call(
        functools.partial(flash_attention_kernel, compute_dtype=cdt,
                          approx_recip=(cdt != jnp.dtype(jnp.float32))),
        out_shape=jax.ShapeDtypeStruct((N, L, E), f32),
        grid_spec=pltpu.PrefetchScalarGridSpec(
            num_scalar_prefetch=0,
            grid=(N, n_q, n_kv),
            in_specs=[
                pl.BlockSpec((None, H, block_q, D), lambda n, qi, kv: (n, 0, qi, 0)),
                pl.BlockSpec((None, H, block_kv, D), lambda n, qi, kv: (n, 0, kv, 0)),
                pl.BlockSpec((None, H, block_kv, D), lambda n, qi, kv: (n, 0, kv, 0)),
                pl.BlockSpec((None, None, block_q, block_kv),
                             lambda n, qi, kv: (n, kv, qi, 0)),
                resident,        # wo_heads (H, D, E)
                resident,        # bo (1, E)
            ],
            out_specs=pl.BlockSpec((None, block_q, E), lambda n, qi, kv: (n, qi, 0)),
            scratch_shapes=[
                pltpu.VMEM((H, block_q, 1), jnp.float32),    # running max m
                pltpu.VMEM((H, block_q, 1), jnp.float32),    # running denom l
                pltpu.VMEM((H, block_q, D), jnp.float32),    # running numerator
            ]),
        compiler_params=pltpu.CompilerParams(
            dimension_semantics=("parallel", "parallel", "arbitrary"),
            vmem_limit_bytes=vmem_limit),
        cost_estimate=pl.CostEstimate(
            flops=int(4 * N * H * L * L * D + 2 * N * L * E * E),
            transcendentals=int(N * H * L * L),
            bytes_accessed=int(3 * N * L * E * cdt.itemsize + 4 * N * L * L
                               + 4 * N * L * E)),
    )(qh, kh, vh, bias, wo_heads, bo)

    # -------------------------- kernel 2: epilogue -------------------------------
    out = pl.pallas_call(
        functools.partial(epilogue_kernel, compute_dtype=cdt),
        out_shape=jax.ShapeDtypeStruct((N, L, E), q.dtype),
        grid_spec=pltpu.PrefetchScalarGridSpec(
            num_scalar_prefetch=0,
            grid=(N, n_q, n_ff),
            in_specs=[
                pl.BlockSpec((None, block_q, E), lambda n, qi, fe: (n, qi, 0)),  # attn
                pl.BlockSpec((None, block_q, E), lambda n, qi, fe: (n, qi, 0)),  # residual q
                resident, resident,                                              # g1, be1
                pl.BlockSpec((E, block_ff), lambda n, qi, fe: (0, fe)),          # w1^T chunk
                pl.BlockSpec((1, block_ff), lambda n, qi, fe: (0, fe)),          # b1 chunk
                pl.BlockSpec((block_ff, E), lambda n, qi, fe: (fe, 0)),          # w2^T chunk
                resident, resident, resident,                                    # b2, g2, be2
            ],
            out_specs=pl.BlockSpec((None, block_q, E), lambda n, qi, fe: (n, qi, 0)),
            scratch_shapes=[
                pltpu.VMEM((block_q, E), jnp.float32),   # x (post-LN1) cache
                pltpu.VMEM((block_q, E), jnp.float32),   # FFN accumulator
            ]),
        compiler_params=pltpu.CompilerParams(
            dimension_semantics=("parallel", "parallel", "arbitrary"),
            vmem_limit_bytes=vmem_limit),
        cost_estimate=pl.CostEstimate(
            flops=int(4 * N * L * E * FE),
            transcendentals=int(4 * N * L),
            bytes_accessed=int(2 * E * FE * cdt.itemsize + 8 * N * L * E
                               + 2 * N * L * E * q.dtype.itemsize)),
    )(attn, q, g1, be1, w1_t, b1, w2_t, b2, g2, be2)

    return out


# -----------------------------------------------------------------------------
# Pure-JAX reference (replica of the PyTorch forward pass, eval mode).
# -----------------------------------------------------------------------------
def transformer_block_reference(q, k, v, mask, params, *, heads):
    N, L, E = q.shape
    D = E // heads

    def split(x):
        return x.reshape(N, L, heads, D)

    qh = jnp.einsum("nlhd,od->nlho", split(q), params["wq"])
    kh = jnp.einsum("nlhd,od->nlho", split(k), params["wk"])
    vh = jnp.einsum("nlhd,od->nlho", split(v), params["wv"])

    energy = jnp.einsum("nqhd,nkhd->nhqk", qh, kh)
    energy = jnp.where(mask[:, None, :, :] == 0, jnp.float32(-1e20), energy)
    attn = jax.nn.softmax(energy / (E ** 0.5), axis=3)
    out = jnp.einsum("nhql,nlhd->nqhd", attn, vh).reshape(N, L, E)
    out = out @ params["wo"].T + params["bo"][0]

    def layer_norm(x, g, b):
        mu = jnp.mean(x, axis=-1, keepdims=True)
        var = jnp.mean((x - mu) ** 2, axis=-1, keepdims=True)
        return (x - mu) * jax.lax.rsqrt(var + 1e-5) * g[0] + b[0]

    x = layer_norm(out + q, params["g1"], params["be1"])
    h1 = jnp.maximum(x @ params["w1"].T + params["b1"][0], 0.0)
    ff = h1 @ params["w2"].T + params["b2"][0]
    return layer_norm(ff + x, params["g2"], params["be2"])


def init_params(key, embed_size, heads, forward_expansion):
    D = embed_size // heads
    FE = forward_expansion * embed_size
    ks = jax.random.split(key, 8)
    s = 0.1
    return {
        "wq": s * jax.random.normal(ks[0], (D, D), jnp.float32),
        "wk": s * jax.random.normal(ks[1], (D, D), jnp.float32),
        "wv": s * jax.random.normal(ks[2], (D, D), jnp.float32),
        "wo": s * jax.random.normal(ks[3], (embed_size, embed_size), jnp.float32),
        "bo": s * jax.random.normal(ks[4], (1, embed_size), jnp.float32),
        "g1": jnp.ones((1, embed_size), jnp.float32),
        "be1": jnp.zeros((1, embed_size), jnp.float32),
        "w1": s * jax.random.normal(ks[5], (FE, embed_size), jnp.float32),
        "b1": s * jax.random.normal(ks[6], (1, FE), jnp.float32),
        "w2": s * jax.random.normal(ks[7], (embed_size, FE), jnp.float32),
        "b2": jnp.zeros((1, embed_size), jnp.float32),
        "g2": jnp.ones((1, embed_size), jnp.float32),
        "be2": jnp.zeros((1, embed_size), jnp.float32),
    }


if __name__ == "__main__":
    N, L, E, H, FWD = 2, 64, 128, 4, 2
    BQ = BKV = 32      # 2 q-tiles x 2 kv-tiles -> exercises the online-softmax pipeline
    BFF = 128          # 2 FE chunks -> exercises the streamed-FFN accumulation

    key = jax.random.PRNGKey(0)
    kq, kk, kv_, kp = jax.random.split(key, 4)
    q = jax.random.normal(kq, (N, L, E), jnp.float32)
    k = jax.random.normal(kk, (N, L, E), jnp.float32)
    v = jax.random.normal(kv_, (N, L, E), jnp.float32)
    # Causal-style mask (every query row attends to at least one key).
    mask = jnp.broadcast_to(jnp.tril(jnp.ones((L, L), jnp.float32)), (N, L, L))

    params = init_params(kp, E, H, FWD)
    ref = transformer_block_reference(q, k, v, mask, params, heads=H)

    # f32 compute path: tight check against the pure-JAX reference.
    out_f32 = transformer_block(q, k, v, mask, params, heads=H,
                                block_q=BQ, block_kv=BKV, block_ff=BFF,
                                compute_dtype=jnp.float32)
    out_f32 = jax.block_until_ready(out_f32)
    assert out_f32.shape == (N, L, E)
    err32 = jnp.max(jnp.abs(out_f32 - ref))
    assert jnp.allclose(out_f32, ref, rtol=1e-2, atol=1e-2), f"f32 max abs diff = {err32}"

    # bf16 MXU path (performance configuration): compare against the reference
    # evaluated on bf16-rounded inputs/weights.
    out_bf16 = transformer_block(q, k, v, mask, params, heads=H,
                                 block_q=BQ, block_kv=BKV, block_ff=BFF,
                                 compute_dtype=jnp.bfloat16)
    out_bf16 = jax.block_until_ready(out_bf16)
    rnd = lambda t: jax.tree_util.tree_map(
        lambda a: a.astype(jnp.bfloat16).astype(jnp.float32), t)
    ref_bf = transformer_block_reference(rnd(q), rnd(k), rnd(v), mask, rnd(params), heads=H)
    out_bf16_f32 = out_bf16.astype(jnp.float32)
    errbf = jnp.max(jnp.abs(out_bf16_f32 - ref_bf))
    assert jnp.allclose(out_bf16_f32, ref_bf, rtol=1e-1, atol=1.5e-1), \
        f"bf16 max abs diff = {errbf}"

    print("KERNEL_OK")
</pallas_src>

<mosaic_0001>
module attributes {stable_mosaic.version = 11 : i64} {
  func.func @qkv_projection_kernel(%arg0: i32, %arg1: i32, %arg2: memref<1x64x128xf32, #tpu.memory_space<vmem>>, %arg3: memref<1x64x128xf32, #tpu.memory_space<vmem>>, %arg4: memref<1x64x128xf32, #tpu.memory_space<vmem>>, %arg5: memref<128x128xf32, #tpu.memory_space<vmem>>, %arg6: memref<128x128xf32, #tpu.memory_space<vmem>>, %arg7: memref<128x128xf32, #tpu.memory_space<vmem>>, %arg8: memref<1x64x128xf32, #tpu.memory_space<vmem>>, %arg9: memref<1x64x128xf32, #tpu.memory_space<vmem>>, %arg10: memref<1x64x128xf32, #tpu.memory_space<vmem>>) attributes {dimension_semantics = [#tpu.dimension_semantics<parallel>, #tpu.dimension_semantics<parallel>], iteration_bounds = array<i64: 2, 1>, scalar_prefetch = 0 : i64, scratch_operands = 0 : i64, tpu.core_type = #tpu.core_type<tc>, window_params = [{transform_indices = @transform_0, window_bounds = array<i64: 1, 64, 128>}, {transform_indices = @transform_1, window_bounds = array<i64: 1, 64, 128>}, {transform_indices = @transform_2, window_bounds = array<i64: 1, 64, 128>}, {pipeline_mode = #tpu.pipeline_mode<synchronous>, transform_indices = @transform_3, window_bounds = array<i64: 128, 128>}, {pipeline_mode = #tpu.pipeline_mode<synchronous>, transform_indices = @transform_4, window_bounds = array<i64: 128, 128>}, {pipeline_mode = #tpu.pipeline_mode<synchronous>, transform_indices = @transform_5, window_bounds = array<i64: 128, 128>}, {transform_indices = @transform_6, window_bounds = array<i64: 1, 64, 128>}, {transform_indices = @transform_7, window_bounds = array<i64: 1, 64, 128>}, {transform_indices = @transform_8, window_bounds = array<i64: 1, 64, 128>}]} {
    %c0 = arith.constant 0 : index
    %c0_0 = arith.constant 0 : index
    %c0_1 = arith.constant 0 : index
    %0 = vector.load %arg2[%c0, %c0_0, %c0_1] : memref<1x64x128xf32, #tpu.memory_space<vmem>>, vector<1x64x128xf32>
    %1 = vector.shape_cast %0 : vector<1x64x128xf32> to vector<64x128xf32>
    %c0_2 = arith.constant 0 : index
    %c0_3 = arith.constant 0 : index
    %2 = vector.load %arg5[%c0_2, %c0_3] : memref<128x128xf32, #tpu.memory_space<vmem>>, vector<128x128xf32>
    %cst = arith.constant dense<0.000000e+00> : vector<64x128xf32>
    %3 = tpu.matmul %1, %2, %cst {dimension_numbers = #tpu.dot_dimension_numbers<[1], [0], [0], [1], [0, 0, 1, 1], [], []>} : vector<64x128xf32>, vector<128x128xf32>, vector<64x128xf32> -> vector<64x128xf32>
    %c0_4 = arith.constant 0 : index
    %c0_5 = arith.constant 0 : index
    %c0_6 = arith.constant 0 : index
    %4 = vector.load %arg8[%c0_4, %c0_5, %c0_6] : memref<1x64x128xf32, #tpu.memory_space<vmem>>, vector<1x64x128xf32>
    %5 = vector.shape_cast %4 : vector<1x64x128xf32> to vector<64x128xf32>
    %6 = vector.shape_cast %3 : vector<64x128xf32> to vector<1x64x128xf32>
    tpu.vector_store %arg8[%c0_4, %c0_5, %c0_6], %6 {strides = array<i32>} : memref<1x64x128xf32, #tpu.memory_space<vmem>>, vector<1x64x128xf32>,
    %c0_7 = arith.constant 0 : index
    %c0_8 = arith.constant 0 : index
    %c0_9 = arith.constant 0 : index
    %7 = vector.load %arg3[%c0_7, %c0_8, %c0_9] : memref<1x64x128xf32, #tpu.memory_space<vmem>>, vector<1x64x128xf32>
    %8 = vector.shape_cast %7 : vector<1x64x128xf32> to vector<64x128xf32>
    %c0_10 = arith.constant 0 : index
    %c0_11 = arith.constant 0 : index
    %9 = vector.load %arg6[%c0_10, %c0_11] : memref<128x128xf32, #tpu.memory_space<vmem>>, vector<128x128xf32>
    %cst_12 = arith.constant dense<0.000000e+00> : vector<64x128xf32>
    %10 = tpu.matmul %8, %9, %cst_12 {dimension_numbers = #tpu.dot_dimension_numbers<[1], [0], [0], [1], [0, 0, 1, 1], [], []>} : vector<64x128xf32>, vector<128x128xf32>, vector<64x128xf32> -> vector<64x128xf32>
    %c0_13 = arith.constant 0 : index
    %c0_14 = arith.constant 0 : index
    %c0_15 = arith.constant 0 : index
    %11 = vector.load %arg9[%c0_13, %c0_14, %c0_15] : memref<1x64x128xf32, #tpu.memory_space<vmem>>, vector<1x64x128xf32>
    %12 = vector.shape_cast %11 : vector<1x64x128xf32> to vector<64x128xf32>
    %13 = vector.shape_cast %10 : vector<64x128xf32> to vector<1x64x128xf32>
    tpu.vector_store %arg9[%c0_13, %c0_14, %c0_15], %13 {strides = array<i32>} : memref<1x64x128xf32, #tpu.memory_space<vmem>>, vector<1x64x128xf32>,
    %c0_16 = arith.constant 0 : index
    %c0_17 = arith.constant 0 : index
    %c0_18 = arith.constant 0 : index
    %14 = vector.load %arg4[%c0_16, %c0_17, %c0_18] : memref<1x64x128xf32, #tpu.memory_space<vmem>>, vector<1x64x128xf32>
    %15 = vector.shape_cast %14 : vector<1x64x128xf32> to vector<64x128xf32>
    %c0_19 = arith.constant 0 : index
    %c0_20 = arith.constant 0 : index
    %16 = vector.load %arg7[%c0_19, %c0_20] : memref<128x128xf32, #tpu.memory_space<vmem>>, vector<128x128xf32>
    %cst_21 = arith.constant dense<0.000000e+00> : vector<64x128xf32>
    %17 = tpu.matmul %15, %16, %cst_21 {dimension_numbers = #tpu.dot_dimension_numbers<[1], [0], [0], [1], [0, 0, 1, 1], [], []>} : vector<64x128xf32>, vector<128x128xf32>, vector<64x128xf32> -> vector<64x128xf32>
    %c0_22 = arith.constant 0 : index
    %c0_23 = arith.constant 0 : index
    %c0_24 = arith.constant 0 : index
    %18 = vector.load %arg10[%c0_22, %c0_23, %c0_24] : memref<1x64x128xf32, #tpu.memory_space<vmem>>, vector<1x64x128xf32>
    %19 = vector.shape_cast %18 : vector<1x64x128xf32> to vector<64x128xf32>
    %20 = vector.shape_cast %17 : vector<64x128xf32> to vector<1x64x128xf32>
    tpu.vector_store %arg10[%c0_22, %c0_23, %c0_24], %20 {strides = array<i32>} : memref<1x64x128xf32, #tpu.memory_space<vmem>>, vector<1x64x128xf32>,
    return
  }
  func.func @transform_0(%arg0: i32, %arg1: i32) -> (i32, i32, i32) {
    %c0_i32 = arith.constant 0 : i32
    %c0_i32_0 = arith.constant 0 : i32
    return %arg0, %arg1, %c0_i32 : i32, i32, i32
  }
  func.func @transform_1(%arg0: i32, %arg1: i32) -> (i32, i32, i32) {
    %c0_i32 = arith.constant 0 : i32
    %c0_i32_0 = arith.constant 0 : i32
    return %arg0, %arg1, %c0_i32 : i32, i32, i32
  }
  func.func @transform_2(%arg0: i32, %arg1: i32) -> (i32, i32, i32) {
    %c0_i32 = arith.constant 0 : i32
    %c0_i32_0 = arith.constant 0 : i32
    return %arg0, %arg1, %c0_i32 : i32, i32, i32
  }
  func.func @transform_3(%arg0: i32, %arg1: i32) -> (i32, i32) {
    %c0_i32 = arith.constant 0 : i32
    %c0_i32_0 = arith.constant 0 : i32
    %c0_i32_1 = arith.constant 0 : i32
    return %c0_i32, %c0_i32_0 : i32, i32
  }
  func.func @transform_4(%arg0: i32, %arg1: i32) -> (i32, i32) {
    %c0_i32 = arith.constant 0 : i32
    %c0_i32_0 = arith.constant 0 : i32
    %c0_i32_1 = arith.constant 0 : i32
    return %c0_i32, %c0_i32_0 : i32, i32
  }
  func.func @transform_5(%arg0: i32, %arg1: i32) -> (i32, i32) {
    %c0_i32 = arith.constant 0 : i32
    %c0_i32_0 = arith.constant 0 : i32
    %c0_i32_1 = arith.constant 0 : i32
    return %c0_i32, %c0_i32_0 : i32, i32
  }
  func.func @transform_6(%arg0: i32, %arg1: i32) -> (i32, i32, i32) {
    %c0_i32 = arith.constant 0 : i32
    %c0_i32_0 = arith.constant 0 : i32
    return %arg0, %arg1, %c0_i32 : i32, i32, i32
  }
  func.func @transform_7(%arg0: i32, %arg1: i32) -> (i32, i32, i32) {
    %c0_i32 = arith.constant 0 : i32
    %c0_i32_0 = arith.constant 0 : i32
    return %arg0, %arg1, %c0_i32 : i32, i32, i32
  }
  func.func @transform_8(%arg0: i32, %arg1: i32) -> (i32, i32, i32) {
    %c0_i32 = arith.constant 0 : i32
    %c0_i32_0 = arith.constant 0 : i32
    return %arg0, %arg1, %c0_i32 : i32, i32, i32
  }
}

</mosaic_0001>

<bundles_post_ra>
// kernel: tpu_custom_call.1
= control target key start
LH: loop header
LB: loop body
LE: loop exit
PB: predicated region body
PF: predicated region fallthrough
CT: control target
= control target key end

     0   :  { %s2022_s0 = inlined_call_operand.hbm [shape: f32[2,64,128], index: 0, kind: input, shape index: {}]   ;;  %s2023_s1 = inlined_call_operand.hbm [shape: f32[2,64,128], index: 1, kind: input, shape index: {}]   ;;  %s2024_s2 = inlined_call_operand.hbm [shape: f32[2,64,128], index: 2, kind: input, shape index: {}]   ;;  %s2025_s3 = inlined_call_operand.hbm [shape: f32[128,128], index: 3, kind: input, shape index: {}]   ;;  %s2026_s4 = inlined_call_operand.hbm [shape: f32[128,128], index: 4, kind: input, shape index: {}]   ;;  %s2027_s5 = inlined_call_operand.hbm [shape: f32[128,128], index: 5, kind: input, shape index: {}]   ;;  %s2028_s6 = inlined_call_operand.hbm [shape: f32[2,64,128], index: 6, kind: output, shape index: {0}]   ;;  %s2029_s7 = inlined_call_operand.hbm [shape: f32[2,64,128], index: 7, kind: output, shape index: {1}]   ;;  %s2030_s8 = inlined_call_operand.hbm [shape: f32[2,64,128], index: 8, kind: output, shape index: {2}]  }
   0x1   :  { %2043 = sst [smem:[#allocation29_spill]] %s2023_s1 }
   0x2   :  { %2044 = sst [smem:[#allocation30_spill]] %s2025_s3 }
   0x3   :  { %2045 = sst [smem:[#allocation31_spill]] %s2026_s4 }
   0x4   :  { %2046 = sst [smem:[#allocation32_spill]] %s2027_s5 }
   0x5   :  { %14 = vsyncpa [#allocation3], 0 }
   0x6   :  { %16 = vsyncpa [#allocation3 + $0x1], 0 }
   0x7   :  { %17 = vsyncpa [#allocation6], 0 }
   0x8   :  { %19 = vsyncpa [#allocation6 + $0x1], 0 }
   0x9   :  { %20 = vsyncpa [#allocation9], 0 }
   0xa   :  { %21 = vsyncpa [#allocation12], 0 }
   0xb   :  { %22 = vsyncpa [#allocation4], 0 }
   0xc   :  { %24 = vsyncpa [#allocation4 + $0x1], 0 }
   0xd   :  { %25 = vsyncpa [#allocation15], 0 }
   0xe   :  { %27 = vsyncpa [#allocation15 + $0x1], 0  ;;  %s1610_s27 = smov 0   ;;  %s1612_s28 = smov 0  }
   0xf   :  { %s1614_s29 = smov 0   ;;  %s1616_s30 = smov 0  }
  0x10   :  { %s1618_s9 = smov 0   ;;  %s1620_s10 = smov 0  }
  0x11 LB: > { %2047 = sst [smem:[#allocation23_spill]] %s1536_s27  ;;  %s1641_s11 = sadd.s32 4294967295, %s1556_s10   ;;  %s1556_s10 = sphi %s1620_s10, %s33_s10   ;;  %s1552_s9 = sphi %s1618_s9, %s2072_s9   ;;  %s1548_s30 = sphi %s1616_s30, %s2071_s30   ;;  %s1544_s29 = sphi %s1614_s29, %s2075_s29   ;;  %s1540_s28 = sphi %s1612_s28, %s2074_s28   ;;  %s1536_s27 = sphi %s1610_s27, %s2073_s27  }
  0x12   : > { %2048 = sst [smem:[#allocation24_spill]] %s1552_s9  ;;  %s2031_s12 = sadd.s32 4294967294, %s1556_s10  }
  0x13   : > { %2049 = sst [smem:[#allocation25_spill]] %s1556_s10  ;;  %p67_p0 = scmp.ne.s32.totalorder %s1540_s28, %s1536_s27 }
  0x14   : > { %p68_p1 = scmp.eq.s32.totalorder %s1641_s11, 0  ;;  %p212_p2 = scmp.eq.s32.totalorder %s1641_s11, 1 }
  0x15   : > { %p218_p3 = scmp.eq.s32.totalorder %s2031_s12, 1  ;;  %p1032_p5 = scmp.ge.s32.totalorder %s1556_s10, 1 }
  0x16   : > { %p1652_p4 = por %p68_p1, %p67_p0  ;;  %p281_p7 = scmp.lt.s32.totalorder %s1556_s10, 3 }
  0x17   : > { %p1657_p6 = por %p218_p3, %p67_p0  ;;  %s2053_s3 = sld [smem:[#allocation30_spill]] }
  0x18   : > { %p1665_p8 = pnand %p1032_p5, %p281_p7  ;;  %s1558_s19 = smov [#allocation8]  }
  0x19   : > { %s2051_s14 = scalar_select %p1657_p6, 1, 0 }
  0x1a   : > { %p1129_p9 = pneg %p1665_p8  ;;  %s294_s20 = sshll.u32 %s1558_s19, 4  ;;  %s295_s20 = int_to_ptr.vmem [resolvable:$true] %s294_s20 }
  0x1b   : > { %2052 = sst [smem:[#allocation26_spill]] %s2051_s14  ;;  %p1036_p11 = scmp.ge.s32.totalorder %s1556_s10, 2 }
  0x1c   : > { %p1673_p10 = pnand %p1129_p9, %p68_p1  ;;  %s2032_s22 = smov 128  }
  0x1d   : > { %s292_s17 = sshll.u32 %s2053_s3, 4  ;;  %s2034_s23 = smov 8   ;;  %s293_s17 = int_to_ptr.hbm [resolvable:$true] %s292_s17 }
  0x1e   : > { %1132 = dma.hbm_to_vmem [thread:$0]  (!%p1673_p10), %s293_s17, 2048, %s295_s20, [#allocation9], %s2032_s22, %s2032_s22, %s2034_s23  }
  0x1f   : > { %s45_s24 = sadd.s32 1, %s1552_s9  ;;  %s54_s25 = sadd.s32 1, %s1544_s29 }
  0x20   : > { %p47_p12 = scmp.ge.s32.totalorder %s45_s24, 2  ;;  %p61_p13 = scmp.ne.s32.totalorder %s1544_s29, %s1540_s28 }
  0x21   : > { %p62_p0 = scmp.eq.s32.totalorder %s1556_s10, 0  ;;  %p1162_p7 = scmp.lt.s32.totalorder %s1556_s10, 2 }
  0x22   : > { %s2077_s24 = smov (%p47_p12, %s45_s24), 0  ;;  %p1692_p5 = por %p212_p2, %p61_p13 }
  0x23   : > { %2056 = sst [smem:[#allocation27_spill]] %s2077_s24  ;;  %p63_p3 = por %p62_p0, %p61_p13 }
  0x24   : > { %s49_s15 = ssub.s32 %s1552_s9, %s2077_s24  ;;  %s2037_s16 = sand.u32 1, %s1544_s29  }
  0x25   : > { %p52_p9 = scmp.eq.s32.totalorder %s49_s15, 0  ;;  %s1702_s17 = sshll.u32 %s2037_s16, 6 }
  0x26   : > { %s1705_s19 = sshll.u32 %s1552_s9, 6  ;;  %p1710_p12 = pnand %p1162_p7, %p63_p3 }
  0x27   : > { %s1708_s20 = scalar_select %p52_p9, %s1544_s29, %s54_s25  }
  0x28   : > { %s360_s22 = sand.u32 1, %s1556_s10   ;;  %s2060_s1 = sld [smem:[#allocation29_spill]] }
  0x29   : > { %2058 = sst [smem:[#allocation28_spill]] %s1708_s20  ;;  %s364_s16 = scalar_lea.vmem [#allocation5], %s1702_s17 }
  0x2a   : > { %s374_s14 = sshll.u32 %s364_s16, 4  ;;  %s1720_s25 = scalar_lea.sflag [#allocation6], %s360_s22  ;;  %s375_s14 = int_to_ptr.vmem [resolvable:$true] %s374_s14 }
  0x2b   : > { %s2061_s9 = smov 8   ;;  %s2062_s20 = smov 128  }
  0x2c   : > { %s2063_s4 = sld [smem:[#allocation31_spill]]  ;;  %s1561_s23 = smov [#allocation10]  }
  0x2d   : > { %s308_s16 = sshll.u32 %s1561_s23, 4  ;;  %s2064_s5 = sld [smem:[#allocation32_spill]]  ;;  %s309_s16 = int_to_ptr.vmem [resolvable:$true] %s308_s16 }
  0x2e   : > { %s371_s15 = scalar_lea.hbm %s2060_s1, %s1705_s19  ;;  %s1562_s27 = smov [#allocation11]  }
  0x2f   : > { %s372_s24 = sshll.u32 %s371_s15, 4  ;;  %s322_s10 = sshll.u32 %s1562_s27, 4  ;;  %s373_s24 = int_to_ptr.hbm [resolvable:$true] %s372_s24  ;;  %s323_s10 = int_to_ptr.vmem [resolvable:$true] %s322_s10 }
  0x30   : > { %1145 = dma.hbm_to_vmem [thread:$0]  (!%p1710_p12), %s373_s24, 1024, %s375_s14, %s1720_s25, %s2062_s20, %s2062_s20, %s2061_s9  }
  0x31   : > { %s347_s24 = scalar_lea.hbm %s2022_s0, %s1705_s19  ;;  %s340_s23 = scalar_lea.vmem [#allocation2], %s1702_s17 }
  0x32   : > { %s306_s3 = sshll.u32 %s2063_s4, 4  ;;  %s350_s15 = sshll.u32 %s340_s23, 4  ;;  %s307_s3 = int_to_ptr.hbm [resolvable:$true] %s306_s3  ;;  %s351_s15 = int_to_ptr.vmem [resolvable:$true] %s350_s15 }
  0x33   : > { %s320_s22 = sshll.u32 %s2064_s5, 4  ;;  %s348_s4 = sshll.u32 %s347_s24, 4  ;;  %s321_s22 = int_to_ptr.hbm [resolvable:$true] %s320_s22  ;;  %s349_s4 = int_to_ptr.hbm [resolvable:$true] %s348_s4 }
  0x34   : > { %1135 = dma.hbm_to_vmem [thread:$0]  (!%p1673_p10), %s307_s3, 2048, %s309_s16, [#allocation9], %s2062_s20, %s2062_s20, %s2061_s9  }
  0x35   : > { %1138 = dma.hbm_to_vmem [thread:$0]  (!%p1673_p10), %s321_s22, 2048, %s323_s10, [#allocation12], %s2062_s20, %s2062_s20, %s2061_s9  }
  0x36   : > { %s2065_s3 = sand.u32 1, %s1544_s29   ;;  %s395_s22 = scalar_lea.hbm %s2024_s2, %s1705_s19 }
  0x37   : > { %s337_s16 = scalar_lea.sflag [#allocation3], %s2065_s3  ;;  %s388_s10 = scalar_lea.vmem [#allocation7], %s1702_s17 }
  0x38   : > { %1142 = dma.hbm_to_vmem [thread:$0]  (!%p1710_p12), %s349_s4, 1024, %s351_s15, %s337_s16, %s2062_s20, %s2062_s20, %s2061_s9  }
  0x39   : > { %s398_s5 = sshll.u32 %s388_s10, 4  ;;  %s396_s1 = sshll.u32 %s395_s22, 4  ;;  %s399_s5 = int_to_ptr.vmem [resolvable:$true] %s398_s5  ;;  %s397_s1 = int_to_ptr.hbm [resolvable:$true] %s396_s1 }
  0x3a   : > { %1148 = dma.hbm_to_vmem [thread:$0]  (!%p1710_p12), %s397_s1, 1024, %s399_s5, %s1720_s25, %s2062_s20, %s2062_s20, %s2061_s9  }
  0x3b   : > { %410 = sbr.rel (%p1665_p8) target bundleno = 306 (0x132), region = 44  ;;  %s1770_s4 = sand.u32 (!%p1665_p8), 1, %s1540_s28  }
  0x3c   : > { %s1773_s19 = sshll.u32 (!%p1665_p8), %s1770_s4, 6  ;;  %s413_s17 = scalar_lea.sflag (!%p1665_p8), [#allocation3], %s1770_s4 }
  0x3d   : > { %s1777_s14 = scalar_lea.vmem (!%p1665_p8), [#allocation2], %s1773_s19 }
  0x40   : > { %1511 = dma.done.wait (%p1652_p4), %s413_s17, 1024  }
  0x41   : > { %1513 = vsyncadd (%p1652_p4), %s413_s17, 4294966272  ;;  %s422_s5 = sand.u32 1, %s1641_s11   ;;  %s1787_s12 = scalar_lea.vmem [#allocation5], %s1773_s19 }
  0x42   : > { %s423_s9 = scalar_lea.sflag [#allocation6], %s422_s5 }
  0x43   : > { %1515 = dma.done.wait (%p1652_p4), %s423_s9, 2048  }
  0x44   : > { %1517 = vsyncadd (%p1652_p4), %s423_s9, 4294965248  ;;  %s1794_s18 = scalar_lea.vmem [#allocation7], %s1773_s19 }
  0x45   : > { %1519 = dma.done.wait (%p68_p1), [#allocation9], 4096  }
  0x46   : > { %1521 = vsyncadd (%p68_p1), [#allocation9], 4294963200 }
  0x47   : > { %1523 = dma.done.wait (%p68_p1), [#allocation12], 2048  }
  0x48   : > { %1525 = vsyncadd (%p68_p1), [#allocation12], 4294965248  ;;  %v680_v0 = vld [vmem:[#allocation11 + $0x78] sm:$0xff]  ;;  %v679_v1 = vld [vmem:[#allocation11 + $0x70] sm:$0xff]  ;;  %s1889_s13 = scalar_lea.vmem [#allocation14], %s1773_s19  ;;  %s1893_s20 = scalar_lea.vmem [#allocation13], %s1773_s19 }
  0x49   : > { %681 = vmatpush.msra.mxu2 %v680_v0  ;;  %v678_v2 = vld [vmem:[#allocation11 + $0x68] sm:$0xff]  ;;  %v1804_v3 = vld [vmem:[#allocation10 + $0x78] sm:$0xff]  ;;  %v1807_v4 = vld [vmem:[#allocation10 + $0x70] sm:$0xff]  ;;  %s1897_s25 = scalar_lea.vmem [#allocation16], %s1773_s19  ;;  %s1913_s24 = sshll.u32 %s1548_s30, 6 }
  0x4a   : > { %608 = vmatpush.msra.mxu1 %v1804_v3  ;;  %v677_v5 = vld [vmem:[#allocation11 + $0x60] sm:$0xff]  ;;  %v1809_v6 = vld [vmem:[#allocation10 + $0x68] sm:$0xff]  ;;  %v534_v7 = vld [vmem:[#allocation8 + $0x78] sm:$0xff]  ;;  %s754_s3 = scalar_lea.hbm %s2028_s6, %s1913_s24  ;;  %s755_s16 = sshll.u32 %s1893_s20, 4  ;;  %s1925_s16 = int_to_ptr.vmem [resolvable:$true] %s755_s16 }
  0x4b   : > { %682 = vmatpush.msra.mxu2 %v679_v1  ;;  %v676_v8 = vld [vmem:[#allocation11 + $0x58] sm:$0xff]  ;;  %v1812_v9 = vld [vmem:[#allocation10 + $0x60] sm:$0xff]  ;;  %535 = vmatpush.msra.mxu0 %v534_v7  ;;  %v533_v10 = vld [vmem:[#allocation8 + $0x70] sm:$0xff]  ;;  %s774_s21 = sshll.u32 %s1889_s13, 4  ;;  %s1923_s27 = sshll.u32 %s754_s3, 4  ;;  %s758_s27 = int_to_ptr.hbm [resolvable:$true] %s1923_s27  ;;  %s1937_s21 = int_to_ptr.vmem [resolvable:$true] %s774_s21 }
  0x4c   : > { %609 = vmatpush.msra.mxu1 %v1807_v4  ;;  %1073 = vmatpush.msra.mxu3 %v534_v7  ;;  %v532_v11 = vld [vmem:[#allocation8 + $0x68] sm:$0xff]  ;;  %v675_v12 = vld [vmem:[#allocation11 + $0x50] sm:$0xff]  ;;  %v1815_v13 = vld [vmem:[#allocation10 + $0x58] sm:$0xff]  ;;  %s773_s10 = scalar_lea.hbm %s2029_s7, %s1913_s24  ;;  %s731_s19 = scalar_lea.sflag [#allocation4], %s1770_s4 }
  0x4d   : > { %683 = vmatpush.msra.mxu2 %v678_v2  ;;  %536 = vmatpush.msra.mxu0 %v533_v10  ;;  %v531_v14 = vld [vmem:[#allocation8 + $0x60] sm:$0xff]  ;;  %v674_v15 = vld [vmem:[#allocation11 + $0x48] sm:$0xff]  ;;  %v1818_v16 = vld [vmem:[#allocation10 + $0x50] sm:$0xff]  ;;  %s1935_s1 = sshll.u32 %s773_s10, 4  ;;  %s1416_s17 = sshra.s32 %s758_s27, 4  ;;  %s1417_s17 = int_to_ptr.hbm [resolvable:$true] %s1416_s17  ;;  %s777_s1 = int_to_ptr.hbm [resolvable:$true] %s1935_s1 }
  0x4e   : > { %610 = vmatpush.msra.mxu1 %v1809_v6  ;;  %1074 = vmatpush.msra.mxu3 %v533_v10  ;;  %v530_v17 = vld [vmem:[#allocation8 + $0x58] sm:$0xff]  ;;  %v673_v18 = vld [vmem:[#allocation11 + $0x40] sm:$0xff]  ;;  %v1821_v19 = vld [vmem:[#allocation10 + $0x48] sm:$0xff]  ;;  %p1423_p8 = scmp.lt.s32.totalorder %s1417_s17, %s2028_s6 }
  0x4f   : > { %684 = vmatpush.msra.mxu2 %v677_v5  ;;  %537 = vmatpush.msra.mxu0 %v532_v11  ;;  %v529_v20 = vld [vmem:[#allocation8 + $0x50] sm:$0xff]  ;;  %v672_v21 = vld [vmem:[#allocation11 + $0x38] sm:$0xff]  ;;  %v1824_v22 = vld [vmem:[#allocation10 + $0x40] sm:$0xff] }
  0x50   : > { %611 = vmatpush.msra.mxu1 %v1812_v9  ;;  %1075 = vmatpush.msra.mxu3 %v532_v11  ;;  %v528_v23 = vld [vmem:[#allocation8 + $0x48] sm:$0xff]  ;;  %v671_v24 = vld [vmem:[#allocation11 + $0x30] sm:$0xff]  ;;  %v1827_v25 = vld [vmem:[#allocation10 + $0x38] sm:$0xff] }
  0x51   : > { %685 = vmatpush.msra.mxu2 %v676_v8  ;;  %538 = vmatpush.msra.mxu0 %v531_v14  ;;  %v527_v26 = vld [vmem:[#allocation8 + $0x40] sm:$0xff]  ;;  %v670_v27 = vld [vmem:[#allocation11 + $0x28] sm:$0xff]  ;;  %v1830_v28 = vld [vmem:[#allocation10 + $0x30] sm:$0xff] }
  0x52   : > { %612 = vmatpush.msra.mxu1 %v1815_v13  ;;  %1076 = vmatpush.msra.mxu3 %v531_v14  ;;  %v526_v29 = vld [vmem:[#allocation8 + $0x38] sm:$0xff]  ;;  %v669_v30 = vld [vmem:[#allocation11 + $0x20] sm:$0xff]  ;;  %v1833_v31 = vld [vmem:[#allocation10 + $0x28] sm:$0xff] }
  0x53   : > { %686 = vmatpush.msra.mxu2 %v675_v12  ;;  %539 = vmatpush.msra.mxu0 %v530_v17  ;;  %v525_v32 = vld [vmem:[#allocation8 + $0x30] sm:$0xff]  ;;  %v668_v33 = vld [vmem:[#allocation11 + $0x18] sm:$0xff]  ;;  %v1836_v34 = vld [vmem:[#allocation10 + $0x20] sm:$0xff] }
  0x54   : > { %613 = vmatpush.msra.mxu1 %v1818_v16  ;;  %1077 = vmatpush.msra.mxu3 %v530_v17  ;;  %v524_v35 = vld [vmem:[#allocation8 + $0x28] sm:$0xff]  ;;  %v667_v36 = vld [vmem:[#allocation11 + $0x10] sm:$0xff]  ;;  %v1839_v37 = vld [vmem:[#allocation10 + $0x18] sm:$0xff] }
  0x55   : > { %687 = vmatpush.msra.mxu2 %v674_v15  ;;  %540 = vmatpush.msra.mxu0 %v529_v20  ;;  %v523_v38 = vld [vmem:[#allocation8 + $0x20] sm:$0xff]  ;;  %v666_v39 = vld [vmem:[#allocation11 + $0x8] sm:$0xff]  ;;  %v1842_v40 = vld [vmem:[#allocation10 + $0x10] sm:$0xff] }
  0x56   : > { %614 = vmatpush.msra.mxu1 %v1821_v19  ;;  %1078 = vmatpush.msra.mxu3 %v529_v20  ;;  %v522_v41 = vld [vmem:[#allocation8 + $0x18] sm:$0xff]  ;;  %v665_v42 = vld [vmem:[#allocation11] sm:$0xff]  ;;  %v1845_v43 = vld [vmem:[#allocation10 + $0x8] sm:$0xff] }
  0x57   : > { %688 = vmatpush.msra.mxu2 %v673_v18  ;;  %541 = vmatpush.msra.mxu0 %v528_v23  ;;  %v657_v44 = vld [vmem:[%s1794_s18] sm:$0xff]  ;;  %v521_v45 = vld [vmem:[#allocation8 + $0x10] sm:$0xff]  ;;  %v520_v48 = vld [vmem:[#allocation8 + $0x8] sm:$0xff] }
  0x58   : > { %615 = vmatpush.msra.mxu1 %v1824_v22  ;;  %1079 = vmatpush.msra.mxu3 %v528_v23  ;;  %v592_v46 = vld [vmem:[#allocation10] sm:$0xff]  ;;  %v517_v51 = vld [vmem:[%s1777_s14 + $0x30] sm:$0xff]  ;;  %v658_v52 = vld [vmem:[%s1794_s18 + $0x8] sm:$0xff] }
  0x59   : > { %689 = vmatpush.msra.mxu2 %v672_v21  ;;  %542 = vmatpush.msra.mxu0 %v527_v26  ;;  %v584_v47 = vld [vmem:[%s1787_s12] sm:$0xff]  ;;  %v585_v53 = vld [vmem:[%s1787_s12 + $0x8] sm:$0xff]  ;;  %v518_v55 = vld [vmem:[%s1777_s14 + $0x38] sm:$0xff] }
  0x5a   : > { %616 = vmatpush.msra.mxu1 %v1827_v25  ;;  %1080 = vmatpush.msra.mxu3 %v527_v26  ;;  %v519_v49 = vld [vmem:[#allocation8] sm:$0xff]  ;;  %v512_v54 = vld [vmem:[%s1777_s14 + $0x8] sm:$0xff]  ;;  %v659_v56 = vld [vmem:[%s1794_s18 + $0x10] sm:$0xff] }
  0x5b   : > { %690 = vmatpush.msra.mxu2 %v671_v24  ;;  %543 = vmatpush.msra.mxu0 %v526_v29  ;;  %v511_v50 = vld [vmem:[%s1777_s14] sm:$0xff]  ;;  %v586_v57 = vld [vmem:[%s1787_s12 + $0x10] sm:$0xff]  ;;  %v660_v59 = vld [vmem:[%s1794_s18 + $0x18] sm:$0xff] }
  0x5c   : > { %617 = vmatpush.msra.mxu1 %v1830_v28  ;;  %1081 = vmatpush.msra.mxu3 %v526_v29  ;;  %v513_v58 = vld [vmem:[%s1777_s14 + $0x10] sm:$0xff]  ;;  %v587_v60 = vld [vmem:[%s1787_s12 + $0x18] sm:$0xff]  ;;  %v661_v62 = vld [vmem:[%s1794_s18 + $0x20] sm:$0xff] }
  0x5d   : > { %691 = vmatpush.msra.mxu2 %v670_v27  ;;  %544 = vmatpush.msra.mxu0 %v525_v32  ;;  %v514_v61 = vld [vmem:[%s1777_s14 + $0x18] sm:$0xff]  ;;  %v588_v63 = vld [vmem:[%s1787_s12 + $0x20] sm:$0xff]  ;;  %v662_v2 = vld [vmem:[%s1794_s18 + $0x28] sm:$0xff] }
  0x5e   : > { %618 = vmatpush.msra.mxu1 %v1833_v31  ;;  %1082 = vmatpush.msra.mxu3 %v525_v32  ;;  %v515_v0 = vld [vmem:[%s1777_s14 + $0x20] sm:$0xff]  ;;  %v591_v1 = vld [vmem:[%s1787_s12 + $0x38] sm:$0xff]  ;;  %v663_v5 = vld [vmem:[%s1794_s18 + $0x30] sm:$0xff] }
  0x5f   : > { %692 = vmatpush.msra.mxu2 %v669_v30  ;;  %545 = vmatpush.msra.mxu0 %v524_v35  ;;  %v664_v7 = vld [vmem:[%s1794_s18 + $0x38] sm:$0xff]  ;;  %s1422_s18 = scalar_lea.hbm %s2028_s6, 128 }
  0x60   : > { %619 = vmatpush.msra.mxu1 %v1836_v34  ;;  %1083 = vmatpush.msra.mxu3 %v524_v35 }
  0x61   : > { %693 = vmatpush.msra.mxu2 %v668_v33  ;;  %546 = vmatpush.msra.mxu0 %v523_v38 }
  0x62   : > { %620 = vmatpush.msra.mxu1 %v1839_v37  ;;  %1084 = vmatpush.msra.mxu3 %v523_v38 }
  0x63   : > { %694 = vmatpush.msra.mxu2 %v667_v36  ;;  %547 = vmatpush.msra.mxu0 %v522_v41 }
  0x64   : > { %621 = vmatpush.msra.mxu1 %v1842_v40  ;;  %1085 = vmatpush.msra.mxu3 %v522_v41 }
  0x65   : > { %695 = vmatpush.msra.mxu2 %v666_v39  ;;  %548 = vmatpush.msra.mxu0 %v521_v45 }
  0x66   : > { %622 = vmatpush.msra.mxu1 %v1845_v43  ;;  %1086 = vmatpush.msra.mxu3 %v521_v45 }
  0x67   : > { %696 = vmatpush.msra.mxu2 %v665_v42  ;;  %549 = vmatpush.msra.mxu0 %v520_v48 }
  0x68   : > { %697 = vmatmul.f32.vlgmr.msra.gmra.mxu2 %v657_v44  ;;  %623 = vmatpush.msra.mxu1 %v592_v46 }
  0x69   : > { %624 = vmatmul.f32.vlgmr.msra.gmra.mxu1 %v584_v47  ;;  %1087 = vmatpush.msra.mxu3 %v520_v48 }
  0x6a   : > { %550 = vmatpush.msra.mxu0 %v519_v49 }
  0x6b   : > { %551 = vmatmul.f32.vlgmr.msra.gmra.mxu0 %v511_v50  ;;  %1088 = vmatpush.msra.mxu3 %v519_v49 }
  0x6c   : > { %569 = vmatmul.f32.vlgmr.msra.gmra.mxu3 %v517_v51 }
  0x6d   : > { %1089 = vmatpush.msrb.mxu3 %v1804_v3  ;;  %v589_v3 = vld [vmem:[%s1787_s12 + $0x28] sm:$0xff] }
  0x6f   : > { %1090 = vmatpush.msrb.mxu3 %v1807_v4  ;;  %v516_v4 = vld [vmem:[%s1777_s14 + $0x28] sm:$0xff]  ;;  %s1418_s14 = scalar_lea.hbm %s1417_s17, 64 }
  0x70   : > { %700 = vmatmul.f32.gmra.mxu2 %v658_v52  ;;  %p1419_p1 = scmp.ne.s32.totalorder %s1417_s17, %s1418_s14  ;;  %p1424_p10 = scmp.lt.s32.totalorder %s1422_s18, %s1418_s14 }
  0x71   : > { %627 = vmatmul.f32.gmra.mxu1 %v585_v53  ;;  %1091 = vmatpush.msrb.mxu3 %v1809_v6  ;;  %v590_v6 = vld [vmem:[%s1787_s12 + $0x30] sm:$0xff] }
  0x72   : > { %p1420_p2 = pnand %p1419_p1, %p1692_p5  ;;  %p1425_p13 = por %p1424_p10, %p1423_p8 }
  0x73   : > { %1092 = vmatpush.msrb.mxu3 %v1812_v9  ;;  %554 = vmatmul.f32.gmra.mxu0 %v512_v54 }
  0x74   : > { %572 = vmatmul.f32.gmra.mxu3 %v518_v55  ;;  %p1421_p4 = pneg %p1420_p2 }
  0x75   : > { %1093 = vmatpush.msrb.mxu3 %v1815_v13 }
  0x76   : > { %p1426_p0 = pnand %p1425_p13, %p1421_p4 }
  0x77   : > { %1094 = vmatpush.msrb.mxu3 %v1818_v16 }
  0x78   : > { %703 = vmatmul.f32.gmra.mxu2 %v659_v56 }
  0x79   : > { %630 = vmatmul.f32.gmra.mxu1 %v586_v57  ;;  %1095 = vmatpush.msrb.mxu3 %v1821_v19 }
  0x7b   : > { %1096 = vmatpush.msrb.mxu3 %v1824_v22  ;;  %557 = vmatmul.f32.gmra.mxu0 %v513_v58 }
  0x7d   : > { %1097 = vmatpush.msrb.mxu3 %v1827_v25 }
  0x7f   : > { %1098 = vmatpush.msrb.mxu3 %v1830_v28 }
  0x80   : > { %706 = vmatmul.f32.gmra.mxu2 %v660_v59 }
  0x81   : > { %633 = vmatmul.f32.gmra.mxu1 %v587_v60  ;;  %1099 = vmatpush.msrb.mxu3 %v1833_v31 }
  0x83   : > { %1100 = vmatpush.msrb.mxu3 %v1836_v34  ;;  %560 = vmatmul.f32.gmra.mxu0 %v514_v61 }
  0x85   : > { %1101 = vmatpush.msrb.mxu3 %v1839_v37 }
  0x87   : > { %1102 = vmatpush.msrb.mxu3 %v1842_v40 }
  0x88   : > { %709 = vmatmul.f32.gmra.mxu2 %v661_v62 }
  0x89   : > { %636 = vmatmul.f32.gmra.mxu1 %v588_v63  ;;  %1103 = vmatpush.msrb.mxu3 %v1845_v43 }
  0x8b   : > { %1104 = vmatpush.msrb.mxu3 %v592_v46  ;;  %563 = vmatmul.f32.gmra.mxu0 %v515_v0 }
  0x8c   : > { %645 = vmatmul.f32.vlgmr.msrb.gmra.mxu3 %v591_v1 }
  0x90   : > { %712 = vmatmul.f32.gmra.mxu2 %v662_v2 }
  0x91   : > { %639 = vmatmul.f32.gmra.mxu1 %v589_v3 }
  0x93   : > { %566 = vmatmul.f32.gmra.mxu0 %v516_v4 }
  0x98   : > { %715 = vmatmul.f32.gmra.mxu2 %v663_v5 }
  0x99   : > { %642 = vmatmul.f32.gmra.mxu1 %v590_v6 }
  0xa0   : > { %718 = vmatmul.f32.gmra.mxu2 %v664_v7 }
  0xe6   : > { %v625_v8 = vpop.f32.mrf.mxu1 }
  0xe7   : > { %649 = vst [vmem:[%s1889_s13] sm:$0xff] %v625_v8 }
  0xe8   : > { %v552_v9 = vpop.f32.mrf.mxu0 }
  0xe9   : > { %576 = vst [vmem:[%s1893_s20] sm:$0xff] %v552_v9 }
  0xeb   : > { %v698_v10 = vpop.f32.mrf.mxu2 }
  0xec   : > { %722 = vst [vmem:[%s1897_s25] sm:$0xff] %v698_v10 }
  0xee   : > { %v628_v11 = vpop.f32.mrf.mxu1 }
  0xef   : > { %650 = vst [vmem:[%s1889_s13 + $0x8] sm:$0xff] %v628_v11  ;;  %v570_v13 = vpop.f32.mrf.mxu3 }
  0xf0   : > { %v555_v12 = vpop.f32.mrf.mxu0  ;;  %582 = vst [vmem:[%s1893_s20 + $0x30] sm:$0xff] %v570_v13 }
  0xf1   : > { %577 = vst [vmem:[%s1893_s20 + $0x8] sm:$0xff] %v555_v12 }
  0xf3   : > { %v701_v14 = vpop.f32.mrf.mxu2 }
  0xf4   : > { %723 = vst [vmem:[%s1897_s25 + $0x8] sm:$0xff] %v701_v14 }
  0xf6   : > { %v631_v15 = vpop.f32.mrf.mxu1 }
  0xf7   : > { %651 = vst [vmem:[%s1889_s13 + $0x10] sm:$0xff] %v631_v15  ;;  %v573_v17 = vpop.f32.mrf.mxu3 }
  0xf8   : > { %v558_v16 = vpop.f32.mrf.mxu0  ;;  %583 = vst [vmem:[%s1893_s20 + $0x38] sm:$0xff] %v573_v17 }
  0xf9   : > { %578 = vst [vmem:[%s1893_s20 + $0x10] sm:$0xff] %v558_v16 }
  0xfb   : > { %v704_v18 = vpop.f32.mrf.mxu2 }
  0xfc   : > { %724 = vst [vmem:[%s1897_s25 + $0x10] sm:$0xff] %v704_v18 }
  0xfe   : > { %v634_v19 = vpop.f32.mrf.mxu1 }
  0xff   : > { %652 = vst [vmem:[%s1889_s13 + $0x18] sm:$0xff] %v634_v19 }
 0x100   : > { %v561_v20 = vpop.f32.mrf.mxu0 }
 0x101   : > { %579 = vst [vmem:[%s1893_s20 + $0x18] sm:$0xff] %v561_v20 }
 0x103   : > { %v707_v21 = vpop.f32.mrf.mxu2 }
 0x104   : > { %725 = vst [vmem:[%s1897_s25 + $0x18] sm:$0xff] %v707_v21 }
 0x106   : > { %v637_v22 = vpop.f32.mrf.mxu1 }
 0x107   : > { %653 = vst [vmem:[%s1889_s13 + $0x20] sm:$0xff] %v637_v22 }
 0x108   : > { %v564_v23 = vpop.f32.mrf.mxu0 }
 0x109   : > { %580 = vst [vmem:[%s1893_s20 + $0x20] sm:$0xff] %v564_v23 }
 0x10b   : > { %v710_v24 = vpop.f32.mrf.mxu2 }
 0x10c   : > { %726 = vst [vmem:[%s1897_s25 + $0x20] sm:$0xff] %v710_v24 }
 0x10e   : > { %v640_v25 = vpop.f32.mrf.mxu1 }
 0x10f   : > { %654 = vst [vmem:[%s1889_s13 + $0x28] sm:$0xff] %v640_v25  ;;  %v646_v26 = vpop.f32.mrf.mxu3 }
 0x110   : > { %656 = vst [vmem:[%s1889_s13 + $0x38] sm:$0xff] %v646_v26  ;;  %v567_v27 = vpop.f32.mrf.mxu0 }
 0x111   : > { %581 = vst [vmem:[%s1893_s20 + $0x28] sm:$0xff] %v567_v27 }
 0x113   : > { %v713_v28 = vpop.f32.mrf.mxu2 }
 0x114   : > { %727 = vst [vmem:[%s1897_s25 + $0x28] sm:$0xff] %v713_v28 }
 0x115   : > { %1429 = shalt.err (!%p1426_p0)
}
 0x116   : > { %s1563_s4 = smov 128   ;;  %s1564_s20 = smov 8   ;;  %v643_v29 = vpop.f32.mrf.mxu1 }
 0x117   : > { %1123 = dma.vmem_to_hbm [thread:$0]  (%p1692_p5), %s1925_s16, 1024, %s758_s27, %s731_s19, %s1563_s4, %s1563_s4, %s1564_s20  }
 0x118   : > { %655 = vst [vmem:[%s1889_s13 + $0x30] sm:$0xff] %v643_v29  ;;  %s1959_s3 = scalar_lea.sflag [#allocation15], %s422_s5  ;;  %s1444_s30 = sshra.s32 %s777_s1, 4  ;;  %s1445_s30 = int_to_ptr.hbm [resolvable:$true] %s1444_s30 }
 0x119   : > { %s1446_s22 = scalar_lea.hbm %s1445_s30, 64  ;;  %s1450_s14 = scalar_lea.hbm %s2029_s7, 128 }
 0x11a   : > { %p1447_p3 = scmp.ne.s32.totalorder %s1445_s30, %s1446_s22  ;;  %p1451_p12 = scmp.lt.s32.totalorder %s1445_s30, %s2029_s7 }
 0x11b   : > { %p1452_p1 = scmp.lt.s32.totalorder %s1450_s14, %s1446_s22 }
 0x11c   : > { %p1448_p7 = pnand %p1447_p3, %p1692_p5 }
 0x11d   : > { %p1453_p2 = por %p1452_p1, %p1451_p12 }
 0x11e   : > { %p1449_p9 = pneg %p1448_p7 }
 0x120   : > { %p1454_p4 = pnand %p1453_p2, %p1449_p9 }
 0x122   : > { %1457 = shalt.err (!%p1454_p4)
}
 0x123   : > { %1124 = dma.vmem_to_hbm [thread:$0]  (%p1692_p5), %s1937_s21, 1024, %s777_s1, %s1959_s3, %s1563_s4, %s1563_s4, %s1564_s20   ;;  %v716_v30 = vpop.f32.mrf.mxu2 }
 0x124   : > { %728 = vst [vmem:[%s1897_s25 + $0x30] sm:$0xff] %v716_v30  ;;  %s792_s13 = scalar_lea.hbm %s2030_s8, %s1913_s24  ;;  %s793_s16 = sshll.u32 %s1897_s25, 4  ;;  %s794_s16 = int_to_ptr.vmem [resolvable:$true] %s793_s16 }
 0x125   : > { %s795_s27 = sshll.u32 %s792_s13, 4  ;;  %s1478_s23 = scalar_lea.hbm %s2030_s8, 128  ;;  %s796_s27 = int_to_ptr.hbm [resolvable:$true] %s795_s27 }
 0x126   : > { %s1472_s19 = sshra.s32 %s796_s27, 4  ;;  %s1473_s19 = int_to_ptr.hbm [resolvable:$true] %s1472_s19 }
 0x127   : > { %s1474_s18 = scalar_lea.hbm %s1473_s19, 64  ;;  %p1479_p0 = scmp.lt.s32.totalorder %s1473_s19, %s2030_s8 }
 0x128   : > { %p1475_p8 = scmp.ne.s32.totalorder %s1473_s19, %s1474_s18  ;;  %p1480_p3 = scmp.lt.s32.totalorder %s1478_s23, %s1474_s18 }
 0x12a   : > { %p1476_p10 = pnand %p1475_p8, %p1692_p5  ;;  %p1481_p7 = por %p1480_p3, %p1479_p0 }
 0x12b   : > { %v719_v31 = vpop.f32.mrf.mxu2 }
 0x12c   : > { %729 = vst [vmem:[%s1897_s25 + $0x38] sm:$0xff] %v719_v31  ;;  %p1477_p13 = pneg %p1476_p10 }
 0x12e   : > { %p1482_p9 = pnand %p1481_p7, %p1477_p13 }
 0x130   : > { %1485 = shalt.err (!%p1482_p9)
}
 0x131   : > { %1125 = dma.vmem_to_hbm [thread:$0]  (%p1692_p5), %s794_s16, 1024, %s796_s27, %s1959_s3, %s1563_s4, %s1563_s4, %s1564_s20  }
 0x132 PF: > { %s2066_s25 = sld [smem:[#allocation23_spill]]  ;;  %p1150_p12 = pnand %p1036_p11, %p1657_p6 }
 0x133   : > { %s2068_s22 = sld [smem:[#allocation25_spill]] }
 0x134   : > { %p1151_p1 = pneg %p1150_p12 }
 0x138   : > { %s810_s10 = sand.u32 1, %s2066_s25  }
 0x139   : > { %s811_s17 = scalar_lea.sflag [#allocation4], %s810_s10 }
 0x13a   : > { %1527 = dma.done.wait (%p1151_p1), %s811_s17, 1024  }
 0x13b   : > { %1529 = vsyncadd (%p1151_p1), %s811_s17, 4294966272  ;;  %s2069_s14 = sadd.s32 4294967294, %s2068_s22  }
 0x13c   : > { %s820_s26 = sand.u32 1, %s2069_s14  }
 0x13d   : > { %s821_s9 = scalar_lea.sflag [#allocation15], %s820_s26 }
 0x13e   : > { %1531 = dma.done.wait (%p1151_p1), %s821_s9, 2048  }
 0x13f   : > { %1533 = vsyncadd (%p1151_p1), %s821_s9, 4294965248  ;;  %s33_s10 = sadd.s32 1, %s2068_s22   ;;  %s2070_s4 = sld [smem:[#allocation28_spill]] }
 0x140   : > { %p30_p5 = scmp.ge.s32.totalorder %s33_s10, 4   ;;  %s2071_s30 = sld [smem:[#allocation24_spill]] }
 0x141   : > { %s2072_s9 = sld [smem:[#allocation27_spill]]  ;;  %s2073_s27 = smov %s1540_s28 }
 0x142   : > { %s2074_s28 = smov %s1544_s29  ;;  %32 = sbr.rel (!%p30_p5) target bundleno = 17 (0x11), region = 157 }
 0x145   : > { %s2075_s29 = smov %s2070_s4 }
 0x147   :  { %837 = vsyncpa [#allocation3], 1 }
 0x148   :  { %839 = vsyncpa [#allocation3 + $0x1], 1 }
 0x149   :  { %840 = vsyncpa [#allocation6], 1 }
 0x14a   :  { %842 = vsyncpa [#allocation6 + $0x1], 1 }
 0x14b   :  { %843 = vsyncpa [#allocation9], 1 }
 0x14c   :  { %844 = vsyncpa [#allocation12], 1 }
 0x14d   :  { %845 = vsyncpa [#allocation4], 1 }
 0x14e   :  { %847 = vsyncpa [#allocation4 + $0x1], 1 }
 0x14f   :  { %848 = vsyncpa [#allocation15], 1 }
 0x150   :  { %850 = vsyncpa [#allocation15 + $0x1], 1 }

</bundles_post_ra>
